<compile_context>
chip_gen: v7x
topology: tpu7x:2x2x1
jax: 0.10.0
libtpu: 0.0.40
codegen_flags: <defaults>
</compile_context>

<pallas_src>
import jax
import jax.numpy as jnp
from jax import lax
from jax.experimental import pallas as pl
from jax.experimental.pallas import tpu as pltpu

FAKE_FILL = 0.002                        # constant the PyTorch fake branch fills targets with
_TARGET_TILE_ROWS = 512                  # amortize ~0.35 us / grid-step overhead
_VMEM_WORKSET_BUDGET = 8 * 1024 * 1024   # accounted CE working set; << v5e's 16 MiB scoped default
_CE_F32_TEMPS = 6                        # ~number of live f32 (TN, C) temporaries in the CE branch


def _round_up(x, m):
    return ((x + m - 1) // m) * m


def _fake_loss_kernel(x_ref, t_ref, out_ref, acc_ref):
    """Accumulates sum((x - 0.002)^2) over rows whose target >= 0."""
    i = pl.program_id(1)

    @pl.when(i == 0)
    def _init():
        acc_ref[...] = jnp.zeros(acc_ref.shape, jnp.float32)

    # TODO(synk): on v6e/v7x the subtract/square could stay in bf16 (cast to f32
    # only at the reduction); kept f32 so numerics match the reference exactly.
    x = x_ref[...].astype(jnp.float32)          # (TN, C)
    valid = t_ref[...] >= 0                     # (TN, 1) bool; padded / ragged rows are False
    d = x - FAKE_FILL
    sq = jnp.where(valid, d * d, 0.0)           # select, not multiply: OOB garbage cannot NaN
    acc_ref[...] += jnp.sum(sq, axis=-1, keepdims=True)

    @pl.when(i == pl.num_programs(1) - 1)
    def _fini():
        out_ref[0, 0] = jnp.sum(acc_ref[...])
        out_ref[0, 1] = jnp.float32(0.0)        # unused by the fake branch


def _ce_loss_kernel(x_ref, t_ref, out_ref, nll_ref, cnt_ref):
    """Accumulates (sum of per-row NLL, count of valid rows) with ignore_index=-1."""
    i = pl.program_id(1)

    @pl.when(i == 0)
    def _init():
        nll_ref[...] = jnp.zeros(nll_ref.shape, jnp.float32)
        cnt_ref[...] = jnp.zeros(cnt_ref.shape, jnp.float32)

    x = x_ref[...].astype(jnp.float32)          # (TN, C)
    t = t_ref[...]                              # (TN, 1) int32
    valid = t >= 0                              # (TN, 1) bool

    _, c = x.shape
    col = lax.broadcasted_iota(jnp.int32, (1, c), 1)          # (1, C) iota, broadcasts vs (TN, 1)
    # x[i, t[i]] gathered from the raw logits (no (TN, C) one-hot, no reuse of x - m)
    picked = jnp.sum(jnp.where(col == t, x, 0.0), axis=-1, keepdims=True)
    m = jnp.max(x, axis=-1, keepdims=True)
    # TODO(synk): bf16 exp on v6e/v7x would roughly double EUP throughput; validate accuracy first.
    lse = m + jnp.log(jnp.sum(jnp.exp(x - m), axis=-1, keepdims=True))
    # select (not multiply) so ragged-tile garbage rows (valid == False) give exactly 0, never NaN.
    nll_ref[...] += jnp.where(valid, lse - picked, 0.0)
    cnt_ref[...] += valid.astype(jnp.float32)

    @pl.when(i == pl.num_programs(1) - 1)
    def _fini():
        out_ref[0, 0] = jnp.sum(nll_ref[...])
        out_ref[0, 1] = jnp.sum(cnt_ref[...])


def gan_lr_loss(inputs, is_real, targets, *, tile_rows=None):
    """JAX/Pallas equivalent of GAN_LR_Loss.forward.

    inputs:  (N, C) float array (streamed in its native dtype, bf16 stays bf16 in HBM).
    is_real: Python bool, selects the branch at trace time (like the PyTorch code).
    targets: (N,) integer class indices, -1 = ignore.
    tile_rows: optional row-tile override (testing / tuning).
    """
    n, c = inputs.shape
    itemsize = jnp.dtype(inputs.dtype).itemsize
    align = 8 * max(1, 4 // itemsize)            # sublane packing: 8 rows f32, 16 rows bf16

    if tile_rows is None:
        # Size against the CE branch's true working set: 2 double-buffered logits
        # tiles (native dtype) + ~6 f32 (TN, C) temporaries + ~2 KiB/row of
        # lane-padded (TN, 1) targets / accumulator buffers.
        bytes_per_row = c * (2 * itemsize + 4 * _CE_F32_TEMPS) + 2048
        max_rows = max(align, (_VMEM_WORKSET_BUDGET // bytes_per_row) // align * align)
        tile_rows = min(_TARGET_TILE_ROWS, max_rows)
    tile_n = max(align, min(_round_up(tile_rows, align), _round_up(n, align)))

    tiles_total = pl.cdiv(n, tile_n)
    num_cores = 2 if tiles_total >= 2 else 1     # feeds both TCs on v7x; cheap serial loop elsewhere
    tiles_per_core = pl.cdiv(tiles_total, num_cores)
    grid_rows = num_cores * tiles_per_core * tile_n
    last_block = tiles_total - 1

    # Only the 4 B/row targets are padded; the logits stream from HBM untouched.
    t = targets.astype(jnp.int32)
    if grid_rows != n:
        t = jnp.pad(t, (0, grid_rows - n), constant_values=-1)   # padded rows are ignored
    t2 = t.reshape(grid_rows, 1)

    def _x_block(p, i):
        # Clamp: an odd tile count leaves one fully-out-of-range trailing grid step;
        # it re-reads the last real logits tile, whose targets tile is all -1, so it
        # contributes exactly zero (and avoids any fully-OOB block read).
        return (jnp.minimum(p * tiles_per_core + i, last_block), 0)

    def _t_block(p, i):
        return (p * tiles_per_core + i, 0)

    if is_real:
        kernel = _ce_loss_kernel
        scratch = [pltpu.VMEM((tile_n, 1), jnp.float32),
                   pltpu.VMEM((tile_n, 1), jnp.float32)]
    else:
        kernel = _fake_loss_kernel
        scratch = [pltpu.VMEM((tile_n, 1), jnp.float32)]

    # Accumulator-safety note: scratch is initialized at i == 0 and drained at
    # i == last.  On a single core the grid iterates p-outer / i-inner, and a
    # "parallel" p split gives each TensorCore its own private scratch instance,
    # so the per-p reduction chains can never interleave on one accumulator.
    partials = pl.pallas_call(
        kernel,
        out_shape=jax.ShapeDtypeStruct((num_cores, 2), jnp.float32),
        grid=(num_cores, tiles_per_core),
        in_specs=[
            pl.BlockSpec((tile_n, c), _x_block),   # logits row tile (ragged tail allowed)
            pl.BlockSpec((tile_n, 1), _t_block),   # padded targets row tile
        ],
        out_specs=pl.BlockSpec((1, 2), lambda p, i: (p, 0),
                               memory_space=pltpu.MemorySpace.SMEM),
        scratch_shapes=scratch,
        compiler_params=pltpu.CompilerParams(
            dimension_semantics=("parallel", "arbitrary")),
    )(inputs, t2)

    total = jnp.sum(partials[:, 0])
    if is_real:
        # NOTE: 0/0 -> NaN when every target is -1, matching PyTorch semantics.
        return total / jnp.sum(partials[:, 1])
    return total / (n * c)


# ----------------------- pure-JAX references (for sanity) --------------------
def _ref_fake(inputs, targets):
    mask = (targets >= 0).astype(jnp.float32)[:, None]
    sq = (inputs.astype(jnp.float32) - FAKE_FILL) ** 2
    return jnp.sum(sq * mask) / (inputs.shape[0] * inputs.shape[1])


def _ref_ce(inputs, targets):
    x = inputs.astype(jnp.float32)
    valid = targets >= 0
    logp = jax.nn.log_softmax(x, axis=-1)
    safe_t = jnp.where(valid, targets, 0)
    nll = -jnp.take_along_axis(logp, safe_t[:, None], axis=-1)[:, 0]
    nll = jnp.where(valid, nll, 0.0)
    return jnp.sum(nll) / jnp.sum(valid.astype(jnp.float32))


if __name__ == "__main__":
    key = jax.random.PRNGKey(0)
    k1, k2, k3, k4 = jax.random.split(key, 4)

    N, C = 16, 32
    inputs = jax.random.normal(k1, (N, C), dtype=jnp.float32)
    targets = jax.random.randint(k2, (N,), minval=-1, maxval=C, dtype=jnp.int32)
    targets = targets.at[0].set(3)   # guarantee at least one valid row for CE

    # fake branch (is_real=False): masked MSE against constant 0.002
    loss_fake = jax.block_until_ready(gan_lr_loss(inputs, False, targets))
    ref_fake = _ref_fake(inputs, targets)
    assert jnp.allclose(loss_fake, ref_fake, rtol=1e-5, atol=1e-6), (loss_fake, ref_fake)

    # real branch (is_real=True): cross-entropy with ignore_index=-1
    loss_real = jax.block_until_ready(gan_lr_loss(inputs, True, targets))
    ref_real = _ref_ce(inputs, targets)
    assert jnp.allclose(loss_real, ref_real, rtol=1e-5, atol=1e-6), (loss_real, ref_real)

    # ragged N: exercises last-tile masking with NO wrapper-side logits padding
    N2 = 13
    inputs2 = jax.random.normal(jax.random.PRNGKey(1), (N2, C), dtype=jnp.float32)
    targets2 = jax.random.randint(jax.random.PRNGKey(2), (N2,), minval=-1, maxval=C,
                                  dtype=jnp.int32)
    targets2 = targets2.at[0].set(1)
    lf2 = jax.block_until_ready(gan_lr_loss(inputs2, False, targets2))
    lr2 = jax.block_until_ready(gan_lr_loss(inputs2, True, targets2))
    assert jnp.allclose(lf2, _ref_fake(inputs2, targets2), rtol=1e-5, atol=1e-6)
    assert jnp.allclose(lr2, _ref_ce(inputs2, targets2), rtol=1e-5, atol=1e-6)

    # multi-tile + odd tile count: exercises the 2-way grid split and the clamped
    # (duplicated, zero-contribution) trailing logits tile.
    N3 = 40
    inputs3 = jax.random.normal(k3, (N3, C), dtype=jnp.float32)
    targets3 = jax.random.randint(k4, (N3,), minval=-1, maxval=C, dtype=jnp.int32)
    targets3 = targets3.at[0].set(2)
    lf3 = jax.block_until_ready(gan_lr_loss(inputs3, False, targets3, tile_rows=16))
    lr3 = jax.block_until_ready(gan_lr_loss(inputs3, True, targets3, tile_rows=16))
    assert jnp.allclose(lf3, _ref_fake(inputs3, targets3), rtol=1e-5, atol=1e-6)
    assert jnp.allclose(lr3, _ref_ce(inputs3, targets3), rtol=1e-5, atol=1e-6)

    print("KERNEL_OK")
</pallas_src>

<mosaic_0001>
module attributes {stable_mosaic.version = 11 : i64} {
  func.func @_fake_loss_kernel(%arg0: i32, %arg1: i32, %arg2: memref<16x32xf32, #tpu.memory_space<vmem>>, %arg3: memref<16x1xi32, #tpu.memory_space<vmem>>, %arg4: memref<1x2xf32, #tpu.memory_space<smem>>, %arg5: memref<16x1xf32, #tpu.memory_space<vmem>>) attributes {dimension_semantics = [#tpu.dimension_semantics<parallel>, #tpu.dimension_semantics<arbitrary>], iteration_bounds = array<i64: 1, 1>, scalar_prefetch = 0 : i64, scratch_operands = 1 : i64, tpu.core_type = #tpu.core_type<tc>, window_params = [{transform_indices = @transform_0, window_bounds = array<i64: 16, 32>}, {transform_indices = @transform_1, window_bounds = array<i64: 16, 1>}, {transform_indices = @transform_2, window_bounds = array<i64: 1, 2>}]} {
    %c0_i32 = arith.constant 0 : i32
    %0 = arith.cmpi eq, %arg1, %c0_i32 : i32
    %1 = arith.extui %0 : i1 to i32
    %c0_i32_0 = arith.constant 0 : i32
    %2 = arith.cmpi ne, %1, %c0_i32_0 : i32
    scf.if %2 {
      %cst_13 = arith.constant 0.000000e+00 : f32
      %22 = vector.broadcast %cst_13 : f32 to vector<16x1xf32>
      %c0_14 = arith.constant 0 : index
      %c0_15 = arith.constant 0 : index
      %23 = vector.load %arg5[%c0_14, %c0_15] : memref<16x1xf32, #tpu.memory_space<vmem>>, vector<16x1xf32>
      tpu.vector_store %arg5[%c0_14, %c0_15], %22 {strides = array<i32>} : memref<16x1xf32, #tpu.memory_space<vmem>>, vector<16x1xf32>,
    } else {
    }
    %c0 = arith.constant 0 : index
    %c0_1 = arith.constant 0 : index
    %3 = vector.load %arg2[%c0, %c0_1] : memref<16x32xf32, #tpu.memory_space<vmem>>, vector<16x32xf32>
    %c0_2 = arith.constant 0 : index
    %c0_3 = arith.constant 0 : index
    %4 = vector.load %arg3[%c0_2, %c0_3] : memref<16x1xi32, #tpu.memory_space<vmem>>, vector<16x1xi32>
    %c0_i32_4 = arith.constant 0 : i32
    %5 = vector.broadcast %c0_i32_4 : i32 to vector<16x1xi32>
    %6 = arith.cmpi sge, %4, %5 : vector<16x1xi32>
    %cst = arith.constant 2.000000e-03 : f32
    %7 = vector.broadcast %cst : f32 to vector<16x32xf32>
    %8 = arith.subf %3, %7 : vector<16x32xf32>
    %9 = arith.mulf %8, %8 : vector<16x32xf32>
    %cst_5 = arith.constant 0.000000e+00 : f32
    %10 = vector.shape_cast %6 : vector<16x1xi1> to vector<16x1xi1>
    %11 = vector.broadcast %10 : vector<16x1xi1> to vector<16x32xi1>
    %12 = vector.broadcast %cst_5 : f32 to vector<16x32xf32>
    %13 = arith.select %11, %9, %12 : vector<16x32xi1>, vector<16x32xf32>
    %c0_6 = arith.constant 0 : index
    %c0_7 = arith.constant 0 : index
    %14 = vector.load %arg5[%c0_6, %c0_7] : memref<16x1xf32, #tpu.memory_space<vmem>>, vector<16x1xf32>
    %cst_8 = arith.constant dense<0.000000e+00> : vector<16xf32>
    %15 = vector.multi_reduction <add>, %13, %cst_8 [1] : vector<16x32xf32> to vector<16xf32>
    %16 = vector.shape_cast %15 : vector<16xf32> to vector<16x1xf32>
    %17 = arith.addf %14, %16 : vector<16x1xf32>
    %c0_9 = arith.constant 0 : index
    %c0_10 = arith.constant 0 : index
    %18 = vector.load %arg5[%c0_9, %c0_10] : memref<16x1xf32, #tpu.memory_space<vmem>>, vector<16x1xf32>
    tpu.vector_store %arg5[%c0_9, %c0_10], %17 {strides = array<i32>} : memref<16x1xf32, #tpu.memory_space<vmem>>, vector<16x1xf32>,
    %c0_i32_11 = arith.constant 0 : i32
    %19 = arith.cmpi eq, %arg1, %c0_i32_11 : i32
    %20 = arith.extui %19 : i1 to i32
    %c0_i32_12 = arith.constant 0 : i32
    %21 = arith.cmpi ne, %20, %c0_i32_12 : i32
    scf.if %21 {
      %c0_13 = arith.constant 0 : index
      %c0_14 = arith.constant 0 : index
      %22 = vector.load %arg5[%c0_13, %c0_14] : memref<16x1xf32, #tpu.memory_space<vmem>>, vector<16x1xf32>
      %23 = vector.shape_cast %22 : vector<16x1xf32> to vector<1x16x1xf32>
      %cst_15 = arith.constant dense<0.000000e+00> : vector<1xf32>
      %24 = vector.multi_reduction <add>, %23, %cst_15 [1, 2] : vector<1x16x1xf32> to vector<1xf32>
      %25 = vector.shape_cast %24 : vector<1xf32> to vector<1x1x1xf32>
      %26 = vector.extract %25[0, 0, 0] : f32 from vector<1x1x1xf32>
      %c0_16 = arith.constant 0 : index
      %c0_17 = arith.constant 0 : index
      %27 = memref.load %arg4[%c0_16, %c0_17] : memref<1x2xf32, #tpu.memory_space<smem>>
      memref.store %26, %arg4[%c0_16, %c0_17] : memref<1x2xf32, #tpu.memory_space<smem>>
      %cst_18 = arith.constant 0.000000e+00 : f32
      %c0_19 = arith.constant 0 : index
      %c1 = arith.constant 1 : index
      %28 = memref.load %arg4[%c0_19, %c1] : memref<1x2xf32, #tpu.memory_space<smem>>
      memref.store %cst_18, %arg4[%c0_19, %c1] : memref<1x2xf32, #tpu.memory_space<smem>>
    } else {
    }
    return
  }
  func.func @transform_0(%arg0: i32, %arg1: i32) -> (i32, i32) {
    %c1_i32 = arith.constant 1 : i32
    %0 = arith.muli %arg0, %c1_i32 : i32
    %1 = arith.addi %0, %arg1 : i32
    %c0_i32 = arith.constant 0 : i32
    %2 = arith.minsi %1, %c0_i32 : i32
    %c0_i32_0 = arith.constant 0 : i32
    %c0_i32_1 = arith.constant 0 : i32
    return %2, %c0_i32_0 : i32, i32
  }
  func.func @transform_1(%arg0: i32, %arg1: i32) -> (i32, i32) {
    %c1_i32 = arith.constant 1 : i32
    %0 = arith.muli %arg0, %c1_i32 : i32
    %1 = arith.addi %0, %arg1 : i32
    %c0_i32 = arith.constant 0 : i32
    %c0_i32_0 = arith.constant 0 : i32
    return %1, %c0_i32 : i32, i32
  }
  func.func @transform_2(%arg0: i32, %arg1: i32) -> (i32, i32) {
    %c0_i32 = arith.constant 0 : i32
    %c0_i32_0 = arith.constant 0 : i32
    return %arg0, %c0_i32 : i32, i32
  }
}

</mosaic_0001>

<bundles_post_ra>
// kernel: tpu_custom_call.1
= control target key start
LH: loop header
LB: loop body
LE: loop exit
PB: predicated region body
PF: predicated region fallthrough
CT: control target
= control target key end

     0   :  { %v176_v2 = vmov 0   ;;  %s219_s0 = inlined_call_operand.vmem [shape: f32[16,32], index: 0, kind: input, shape index: {}]   ;;  %s220_s1 = inlined_call_operand.vmem [shape: s32[16,1], index: 1, kind: input, shape index: {}]   ;;  %s221_s2 = inlined_call_operand.hbm [shape: f32[1,2], index: 2, kind: output, shape index: {}]  }
   0x1   :  { %v75_v0 = vld [vmem:[%s220_s1] sm:$0xff]  ;;  %v76_v1 = vld [vmem:[%s220_s1 + $0x8] sm:$0xff]  ;;  %163 = vset.pattern.permute.xlu0 %v176_v2 }
   0x2   :  { %vm77_vm0 = vcmp.ge.s32.totalorder %v75_v0, 0  ;;  %vm78_vm1 = vcmp.ge.s32.totalorder %v76_v1, 0 }
   0x3   :  { %7 = vsyncpa [#allocation4], 0  ;;  %v83_v3 = vsel %vm77_vm0, 1, %v176_v2  ;;  %v84_v4 = vsel %vm78_vm1, 1, %v176_v2  ;;  %v73_v5 = vld [vmem:[%s219_s0] sm:$0xff]  ;;  %v74_v7 = vld [vmem:[%s219_s0 + $0x8] sm:$0xff] }
   0x4   :  { %86 = vperm.xlu0 %163, %v83_v3   ;;  %v155_v6 = vadd.f32 -0.002, %v73_v5  ;;  %v156_v9 = vadd.f32 -0.002, %v74_v7  ;;  %vm97_vm2 = vcmask 261120   ;;  %vm70_vm5 = vcmask 7168  }
   0x5   :  { %v177_v17 = vmov 0.0   ;;  %s178_s0 = smov 0.0   ;;  %s164_s19 = scalar_lea.hbm %s221_s2, 16 }
   0x6   :  { %v81_v8 = vmul.f32 %v155_v6, %v155_v6  ;;  %v82_v12 = vmul.f32 %v156_v9, %v156_v9  ;;  %71 = vst.msk [vmem:[#allocation2] sm:$0xff] %vm70_vm5, %v177_v17  ;;  %72 = vst.msk [vmem:[#allocation2 + $0x8] sm:$0xff] %vm70_vm5, %v177_v17  ;;  %129 = sst [smem:[#allocation3 + $0x1]] %s178_s0  ;;  %p165_p0 = scmp.ne.s32.totalorder %s221_s2, %s164_s19 }
   0x7   :  { %p168_p1 = scmp.lt.u32.totalorder %s164_s19, %s221_s2 }
   0x8   :  { %89 = vperm.xlu0 %163, %v84_v4  }
   0x9   :  { %p170_p2 = pnand %p168_p1, %p165_p0 }
   0xd   :  { %v95_v18 = vld [vmem:[#allocation2] sm:$0xff]  ;;  %v96_v21 = vld [vmem:[#allocation2 + $0x8] sm:$0xff] }
  0x83   :  { %v87_v10 = vpop.permute.xlu0 %86 }
  0x84   :  { %vm91_vm3 = vcmp.eq.s32.totalorder %v87_v10, 1 }
  0x85   :  { %v93_v11 = vsel %vm91_vm3, %v81_v8, 0.0 }
  0x86   :  { %v98_v13 = vsel %vm97_vm2, %v93_v11, 0.0 }
  0x87   :  { %v90_v14 = vpop.permute.xlu0 %89  ;;  %99 = vadd.xlane.f32.xlu1 %v98_v13 }
  0x88   :  { %vm92_vm4 = vcmp.eq.s32.totalorder %v90_v14, 1 }
  0x89   :  { %v94_v15 = vsel %vm92_vm4, %v82_v12, 0.0 }
  0x8a   :  { %v101_v16 = vsel %vm97_vm2, %v94_v15, 0.0 }
  0x8b   :  { %102 = vadd.xlane.f32.xlu1 %v101_v16 }
 0x114   :  { %v100_v19 = vpop.xlane.xlu1 %99 }
 0x115   :  { %v104_v20 = vadd.f32 %v100_v19, %v95_v18 }
 0x117   :  { %107 = vst.msk [vmem:[#allocation2] sm:$0xff] %vm70_vm5, %v104_v20 }
 0x118   :  { %v103_v22 = vpop.xlane.xlu1 %102 }
 0x119   :  { %v105_v23 = vadd.f32 %v103_v22, %v96_v21 }
 0x11b   :  { %108 = vst.msk [vmem:[#allocation2 + $0x8] sm:$0xff] %vm70_vm5, %v105_v23 }
 0x11e   :  { %v112_v24 = vld [vmem:[#allocation2] sm:$0xff] }
 0x11f   :  { %v114_v26 = vsel %vm70_vm5, %v112_v24, 0.0 }
 0x122   :  { %v113_v25 = vld [vmem:[#allocation2 + $0x8] sm:$0xff] }
 0x123   :  { %v115_v27 = vsel %vm70_vm5, %v113_v25, 0.0 }
 0x124   :  { %v116_v28 = vadd.f32 %v115_v27, %v114_v26 }
 0x126   :  { %117 = vadd.xlane.f32.xlu0 %v116_v28 }
 0x1b3   :  { %v118_v29 = vpop.xlane.xlu0 %117 }
 0x1b4   :  { %v119_v30 = vrot.slane %v118_v29, 4 }
 0x1b6   :  { %v120_v31 = vadd.f32 %v119_v30, %v118_v29 }
 0x1b8   :  { %v121_v32 = vrot.slane %v120_v31, 2 }
 0x1ba   :  { %v122_v33 = vadd.f32 %v121_v32, %v120_v31 }
 0x1bc   :  { %v123_v34 = vrot.slane %v122_v33, 1 }
 0x1be   :  { %v124_v35 = vadd.f32 %v123_v34, %v122_v33 }
 0x1c0   :  { %157 = vpush %v124_v35 }
 0x1f1   :  { %s158_s1 = spop %157 }
 0x1f2   :  { %127 = sst [smem:[#allocation3]] %s158_s1 }
 0x1f3   :  { %173 = shalt.err (!%p170_p2)
}
 0x1f4   :  { %s179_s24 = smov [#allocation3]  }
 0x1f5   :  { %137 = dma.smem_to_hbm %s179_s24, 16, %s221_s2, [#allocation4]  }
 0x1f6   :  { %174 = dma.done.wait [#allocation4], 16  }
 0x1f7   :  { %175 = vsyncadd [#allocation4], 4294967280 }
 0x1f8   :  { %141 = sfence }
 0x1f9   :  { %142 = vsyncpa [#allocation4], 1 }

</bundles_post_ra>
